<compile_context>
chip_gen: v6e
topology: v6e:2x2x1
jax: 0.10.0
libtpu: 0.0.40
codegen_flags: <defaults>
</compile_context>

<pallas_src>
import jax
import jax.numpy as jnp
from jax.experimental import pallas as pl
from jax.experimental.pallas import tpu as pltpu


def _round_up(n, m):
    return ((n + m - 1) // m) * m


# --------------------------------------------------------------------------
# Kernel: one batch tile of the whole fused MLP.
# Weights arrive pre-transposed (in, out); eval-mode BN folded into (w1, b1)
# and (w2, b2); the 64-wide hidden and num_classes are zero-padded to 128
# lanes so every intermediate matmul / store is lane-dense.
# --------------------------------------------------------------------------
def _mlp_kernel(x_ref,
                w1_ref, b1_ref,
                w2_ref, b2_ref,
                w3_ref, b3_ref,
                w4_ref, b4_ref,
                o_ref):
    # Explicit bf16 cast of the streamed f32 input (rides the idle VPU slot;
    # required so the dominant layer-1 dot uses the bf16 MXU path).
    x = x_ref[...].astype(w1_ref.dtype)

    # ---- Linear(E,256) [BN1 folded] + ReLU (Dropout = identity, eval) ----
    h = jnp.dot(x, w1_ref[...], preferred_element_type=jnp.float32)
    h = jnp.maximum(h + b1_ref[...], 0.0)

    # ---- Linear(256,128) [BN2 folded] + ReLU ----
    h = jnp.dot(h.astype(w2_ref.dtype), w2_ref[...],
                preferred_element_type=jnp.float32)
    h = jnp.maximum(h + b2_ref[...], 0.0)

    # ---- Linear(128,64) + ReLU (64 -> 128 lanes, padded cols are zero) ----
    h = jnp.dot(h.astype(w3_ref.dtype), w3_ref[...],
                preferred_element_type=jnp.float32)
    h = jnp.maximum(h + b3_ref[...], 0.0)

    # ---- Linear(64,num_classes) (num_classes -> 128 lanes) ----
    o = jnp.dot(h.astype(w4_ref.dtype), w4_ref[...],
                preferred_element_type=jnp.float32)
    o_ref[...] = (o + b4_ref[...]).astype(o_ref.dtype)


# --------------------------------------------------------------------------
# One-time parameter preparation (hoisted out of the per-call forward):
# fold eval-mode BN into the preceding Linear, pad only the 64-wide hidden
# and the class dim to 128 lanes, cast matmul operands to bf16.
# --------------------------------------------------------------------------
def prepare_params(params, *, compute_dtype=jnp.bfloat16, eps=1e-5):
    E = params["w1"].shape[0]
    num_classes = params["w4"].shape[1]
    h3_pad = 128                          # pad 64-wide hidden to full lanes
    n_pad = _round_up(num_classes, 128)   # lane-dense output

    def bn_fold(gamma, beta, mean, var):
        scale = gamma * jax.lax.rsqrt(var + eps)
        shift = beta - mean * scale
        return scale, shift

    s1, t1 = bn_fold(params["bn1_g"], params["bn1_b"],
                     params["bn1_m"], params["bn1_v"])
    s2, t2 = bn_fold(params["bn2_g"], params["bn2_b"],
                     params["bn2_m"], params["bn2_v"])

    # Fold BN scale/shift into Linear weight/bias: (xW+b)*s + t = x(W*s) + (b*s+t)
    w1 = params["w1"] * s1[None, :]
    b1 = params["b1"] * s1 + t1
    w2 = params["w2"] * s2[None, :]
    b2 = params["b2"] * s2 + t2
    w3, b3 = params["w3"], params["b3"]
    w4, b4 = params["w4"], params["b4"]

    # Zero-pad only the tiny trailing dims (padded cols contribute exact zeros).
    w3p = jnp.zeros((128, h3_pad), jnp.float32).at[:, :64].set(w3)
    b3p = jnp.zeros((h3_pad,), jnp.float32).at[:64].set(b3)
    w4p = jnp.zeros((h3_pad, n_pad), jnp.float32).at[:64, :num_classes].set(w4)
    b4p = jnp.zeros((n_pad,), jnp.float32).at[:num_classes].set(b4)

    return {
        "w1": w1.astype(compute_dtype),  "b1": b1[None, :].astype(jnp.float32),
        "w2": w2.astype(compute_dtype),  "b2": b2[None, :].astype(jnp.float32),
        "w3": w3p.astype(compute_dtype), "b3": b3p[None, :].astype(jnp.float32),
        "w4": w4p.astype(compute_dtype), "b4": b4p[None, :].astype(jnp.float32),
        "E": E, "num_classes": num_classes, "N_pad": n_pad,
        "compute_dtype": compute_dtype,
    }


def text_classifier_forward(x, fp, *, tile_b=2048, min_grid_steps=2,
                            vmem_limit_bytes=48 * 1024 * 1024,
                            out_dtype=jnp.bfloat16, return_padded=False):
    """x: (B, E) float32 (streamed raw, no host pad/cast).  fp: prepare_params().

    Defaults are safe on all of v5e / v6e / v7x.  On v5e/v6e (128 MiB VMEM)
    you may raise tile_b to 4096 and vmem_limit_bytes to ~96 MiB; keep the
    defaults on v7x (64 MiB VMEM) where min_grid_steps=2 also keeps both
    TensorCores busy for large batches.
    """
    B, E = x.shape
    assert E == fp["E"], "embedding_dim mismatch with prepared params"
    n_pad, num_classes = fp["N_pad"], fp["num_classes"]

    # Batch tile: multiple of 8 sublanes, capped at tile_b, and sized so the
    # grid has >= min_grid_steps steps for large B (megacore on v7x).  The
    # batch itself is NOT padded; Pallas handles the ragged last block.
    tb = max(8, min(tile_b, _round_up(-(-B // min_grid_steps), 8)))
    tb = min(tb, _round_up(B, 8))
    grid = (pl.cdiv(B, tb),)

    # x block: (tb, E) -- E is the full array dim, so no (8,128) lane padding
    # is required and no zero-inflated DMA bytes are streamed.
    x_spec = pl.BlockSpec((tb, E), lambda i: (i, 0))
    out_spec = pl.BlockSpec((tb, n_pad), lambda i: (i, 0))

    def resident(shape):
        # Constant block index -> fetched once, stays resident across grid steps.
        return pl.BlockSpec(shape, lambda i: tuple(0 for _ in shape))

    args = (x,
            fp["w1"], fp["b1"],
            fp["w2"], fp["b2"],
            fp["w3"], fp["b3"],
            fp["w4"], fp["b4"])
    in_specs = [x_spec] + [resident(a.shape) for a in args[1:]]

    out = pl.pallas_call(
        _mlp_kernel,
        out_shape=jax.ShapeDtypeStruct((B, n_pad), out_dtype),
        grid=grid,
        in_specs=in_specs,
        out_specs=out_spec,
        compiler_params=pltpu.CompilerParams(
            # Batch tiles are independent -> shard across TCs on v7x.
            dimension_semantics=("parallel",),
            vmem_limit_bytes=vmem_limit_bytes,
        ),
    )(*args)

    if return_padded:
        # Lane-padded (B, 128) logits; padded class lanes hold bias-only
        # values and should be ignored/masked by the consumer.
        return out
    return out[:, :num_classes]


def init_params(key, embedding_dim, num_classes):
    """Deterministic synthetic parameters matching nn.Module __init__ shapes.

    PyTorch Linear stores weight as (out, in); here we store the transposed
    (in, out) layout used directly by the kernel.
    """
    ks = jax.random.split(key, 8)
    p = {}
    p["w1"] = (jax.random.normal(ks[0], (embedding_dim, 256), jnp.float32)
               / jnp.sqrt(embedding_dim).astype(jnp.float32))
    p["b1"] = jax.random.normal(ks[1], (256,), jnp.float32) * 0.01
    p["w2"] = jax.random.normal(ks[2], (256, 128), jnp.float32) / jnp.sqrt(256.0)
    p["b2"] = jax.random.normal(ks[3], (128,), jnp.float32) * 0.01
    p["w3"] = jax.random.normal(ks[4], (128, 64), jnp.float32) / jnp.sqrt(128.0)
    p["b3"] = jax.random.normal(ks[5], (64,), jnp.float32) * 0.01
    p["w4"] = jax.random.normal(ks[6], (64, num_classes), jnp.float32) / jnp.sqrt(64.0)
    p["b4"] = jax.random.normal(ks[7], (num_classes,), jnp.float32) * 0.01
    # BatchNorm1d params / running stats (deterministic, non-trivial).
    p["bn1_g"] = jnp.full((256,), 1.1, jnp.float32)
    p["bn1_b"] = jnp.full((256,), 0.05, jnp.float32)
    p["bn1_m"] = jnp.full((256,), 0.02, jnp.float32)
    p["bn1_v"] = jnp.full((256,), 0.9, jnp.float32)
    p["bn2_g"] = jnp.full((128,), 0.95, jnp.float32)
    p["bn2_b"] = jnp.full((128,), -0.03, jnp.float32)
    p["bn2_m"] = jnp.full((128,), -0.01, jnp.float32)
    p["bn2_v"] = jnp.full((128,), 1.2, jnp.float32)
    return p


def _reference_forward(x, params):
    """Pure-JAX f32 reference of the same eval-mode forward, for verification."""
    eps = 1e-5
    h = x @ params["w1"] + params["b1"]
    h = (h - params["bn1_m"]) / jnp.sqrt(params["bn1_v"] + eps) * params["bn1_g"] + params["bn1_b"]
    h = jnp.maximum(h, 0.0)
    h = h @ params["w2"] + params["b2"]
    h = (h - params["bn2_m"]) / jnp.sqrt(params["bn2_v"] + eps) * params["bn2_g"] + params["bn2_b"]
    h = jnp.maximum(h, 0.0)
    h = jnp.maximum(h @ params["w3"] + params["b3"], 0.0)
    return h @ params["w4"] + params["b4"]


if __name__ == "__main__":
    key = jax.random.PRNGKey(0)
    k_x, k_p = jax.random.split(key)

    batch = 8
    embedding_dim = 32
    num_classes = 4

    x = jax.random.normal(k_x, (batch, embedding_dim), jnp.float32)
    params = init_params(k_p, embedding_dim, num_classes)

    # One-time fold/pad/cast of parameters (hoisted out of the forward path).
    fp = prepare_params(params)

    out = jax.block_until_ready(text_classifier_forward(x, fp))
    ref = jax.block_until_ready(_reference_forward(x, params))

    assert out.shape == (batch, num_classes)
    out_f32 = out.astype(jnp.float32)
    max_err = float(jnp.max(jnp.abs(out_f32 - ref)))
    # bf16 MXU operands + bf16 output (f32 accumulation) vs. pure-f32 reference.
    assert jnp.allclose(out_f32, ref, atol=5e-2, rtol=5e-2), f"max_abs_err={max_err}"

    print("KERNEL_OK")
</pallas_src>

<mosaic_0001>
module attributes {stable_mosaic.version = 11 : i64} {
  func.func @_mlp_kernel(%arg0: i32, %arg1: memref<8x32xf32, #tpu.memory_space<vmem>>, %arg2: memref<32x256xbf16, #tpu.memory_space<vmem>>, %arg3: memref<1x256xf32, #tpu.memory_space<vmem>>, %arg4: memref<256x128xbf16, #tpu.memory_space<vmem>>, %arg5: memref<1x128xf32, #tpu.memory_space<vmem>>, %arg6: memref<128x128xbf16, #tpu.memory_space<vmem>>, %arg7: memref<1x128xf32, #tpu.memory_space<vmem>>, %arg8: memref<128x128xbf16, #tpu.memory_space<vmem>>, %arg9: memref<1x128xf32, #tpu.memory_space<vmem>>, %arg10: memref<8x128xbf16, #tpu.memory_space<vmem>>) attributes {dimension_semantics = [#tpu.dimension_semantics<parallel>], iteration_bounds = array<i64: 1>, scalar_prefetch = 0 : i64, scratch_operands = 0 : i64, tpu.core_type = #tpu.core_type<tc>, window_params = [{transform_indices = @transform_0, window_bounds = array<i64: 8, 32>}, {pipeline_mode = #tpu.pipeline_mode<synchronous>, transform_indices = @transform_1, window_bounds = array<i64: 32, 256>}, {pipeline_mode = #tpu.pipeline_mode<synchronous>, transform_indices = @transform_2, window_bounds = array<i64: 1, 256>}, {pipeline_mode = #tpu.pipeline_mode<synchronous>, transform_indices = @transform_3, window_bounds = array<i64: 256, 128>}, {pipeline_mode = #tpu.pipeline_mode<synchronous>, transform_indices = @transform_4, window_bounds = array<i64: 1, 128>}, {pipeline_mode = #tpu.pipeline_mode<synchronous>, transform_indices = @transform_5, window_bounds = array<i64: 128, 128>}, {pipeline_mode = #tpu.pipeline_mode<synchronous>, transform_indices = @transform_6, window_bounds = array<i64: 1, 128>}, {pipeline_mode = #tpu.pipeline_mode<synchronous>, transform_indices = @transform_7, window_bounds = array<i64: 128, 128>}, {pipeline_mode = #tpu.pipeline_mode<synchronous>, transform_indices = @transform_8, window_bounds = array<i64: 1, 128>}, {transform_indices = @transform_9, window_bounds = array<i64: 8, 128>}]} {
    %c0 = arith.constant 0 : index
    %c0_0 = arith.constant 0 : index
    %0 = vector.load %arg1[%c0, %c0_0] : memref<8x32xf32, #tpu.memory_space<vmem>>, vector<8x32xf32>
    %1 = arith.truncf %0 : vector<8x32xf32> to vector<8x32xbf16>
    %c0_1 = arith.constant 0 : index
    %c0_2 = arith.constant 0 : index
    %2 = vector.load %arg2[%c0_1, %c0_2] : memref<32x256xbf16, #tpu.memory_space<vmem>>, vector<32x256xbf16>
    %cst = arith.constant dense<0.000000e+00> : vector<8x256xf32>
    %3 = tpu.matmul %1, %2, %cst {dimension_numbers = #tpu.dot_dimension_numbers<[1], [0], [0], [1], [0, 0, 1, 1], [], []>} : vector<8x32xbf16>, vector<32x256xbf16>, vector<8x256xf32> -> vector<8x256xf32>
    %c0_3 = arith.constant 0 : index
    %c0_4 = arith.constant 0 : index
    %4 = vector.load %arg3[%c0_3, %c0_4] : memref<1x256xf32, #tpu.memory_space<vmem>>, vector<1x256xf32>
    %5 = vector.broadcast %4 : vector<1x256xf32> to vector<8x256xf32>
    %6 = arith.addf %3, %5 : vector<8x256xf32>
    %cst_5 = arith.constant 0.000000e+00 : f32
    %7 = vector.broadcast %cst_5 : f32 to vector<8x256xf32>
    %8 = arith.maximumf %6, %7 : vector<8x256xf32>
    %9 = arith.truncf %8 : vector<8x256xf32> to vector<8x256xbf16>
    %c0_6 = arith.constant 0 : index
    %c0_7 = arith.constant 0 : index
    %10 = vector.load %arg4[%c0_6, %c0_7] : memref<256x128xbf16, #tpu.memory_space<vmem>>, vector<256x128xbf16>
    %cst_8 = arith.constant dense<0.000000e+00> : vector<8x128xf32>
    %11 = tpu.matmul %9, %10, %cst_8 {dimension_numbers = #tpu.dot_dimension_numbers<[1], [0], [0], [1], [0, 0, 1, 1], [], []>} : vector<8x256xbf16>, vector<256x128xbf16>, vector<8x128xf32> -> vector<8x128xf32>
    %c0_9 = arith.constant 0 : index
    %c0_10 = arith.constant 0 : index
    %12 = vector.load %arg5[%c0_9, %c0_10] : memref<1x128xf32, #tpu.memory_space<vmem>>, vector<1x128xf32>
    %13 = vector.broadcast %12 : vector<1x128xf32> to vector<8x128xf32>
    %14 = arith.addf %11, %13 : vector<8x128xf32>
    %cst_11 = arith.constant 0.000000e+00 : f32
    %15 = vector.broadcast %cst_11 : f32 to vector<8x128xf32>
    %16 = arith.maximumf %14, %15 : vector<8x128xf32>
    %17 = arith.truncf %16 : vector<8x128xf32> to vector<8x128xbf16>
    %c0_12 = arith.constant 0 : index
    %c0_13 = arith.constant 0 : index
    %18 = vector.load %arg6[%c0_12, %c0_13] : memref<128x128xbf16, #tpu.memory_space<vmem>>, vector<128x128xbf16>
    %cst_14 = arith.constant dense<0.000000e+00> : vector<8x128xf32>
    %19 = tpu.matmul %17, %18, %cst_14 {dimension_numbers = #tpu.dot_dimension_numbers<[1], [0], [0], [1], [0, 0, 1, 1], [], []>} : vector<8x128xbf16>, vector<128x128xbf16>, vector<8x128xf32> -> vector<8x128xf32>
    %c0_15 = arith.constant 0 : index
    %c0_16 = arith.constant 0 : index
    %20 = vector.load %arg7[%c0_15, %c0_16] : memref<1x128xf32, #tpu.memory_space<vmem>>, vector<1x128xf32>
    %21 = vector.broadcast %20 : vector<1x128xf32> to vector<8x128xf32>
    %22 = arith.addf %19, %21 : vector<8x128xf32>
    %cst_17 = arith.constant 0.000000e+00 : f32
    %23 = vector.broadcast %cst_17 : f32 to vector<8x128xf32>
    %24 = arith.maximumf %22, %23 : vector<8x128xf32>
    %25 = arith.truncf %24 : vector<8x128xf32> to vector<8x128xbf16>
    %c0_18 = arith.constant 0 : index
    %c0_19 = arith.constant 0 : index
    %26 = vector.load %arg8[%c0_18, %c0_19] : memref<128x128xbf16, #tpu.memory_space<vmem>>, vector<128x128xbf16>
    %cst_20 = arith.constant dense<0.000000e+00> : vector<8x128xf32>
    %27 = tpu.matmul %25, %26, %cst_20 {dimension_numbers = #tpu.dot_dimension_numbers<[1], [0], [0], [1], [0, 0, 1, 1], [], []>} : vector<8x128xbf16>, vector<128x128xbf16>, vector<8x128xf32> -> vector<8x128xf32>
    %c0_21 = arith.constant 0 : index
    %c0_22 = arith.constant 0 : index
    %28 = vector.load %arg9[%c0_21, %c0_22] : memref<1x128xf32, #tpu.memory_space<vmem>>, vector<1x128xf32>
    %29 = vector.broadcast %28 : vector<1x128xf32> to vector<8x128xf32>
    %30 = arith.addf %27, %29 : vector<8x128xf32>
    %31 = arith.truncf %30 : vector<8x128xf32> to vector<8x128xbf16>
    %c0_23 = arith.constant 0 : index
    %c0_24 = arith.constant 0 : index
    %32 = vector.load %arg10[%c0_23, %c0_24] : memref<8x128xbf16, #tpu.memory_space<vmem>>, vector<8x128xbf16>
    tpu.vector_store %arg10[%c0_23, %c0_24], %31 {strides = array<i32>} : memref<8x128xbf16, #tpu.memory_space<vmem>>, vector<8x128xbf16>,
    return
  }
  func.func @transform_0(%arg0: i32) -> (i32, i32) {
    %c0_i32 = arith.constant 0 : i32
    %c0_i32_0 = arith.constant 0 : i32
    return %arg0, %c0_i32 : i32, i32
  }
  func.func @transform_1(%arg0: i32) -> (i32, i32) {
    %c0_i32 = arith.constant 0 : i32
    %c0_i32_0 = arith.constant 0 : i32
    %c0_i32_1 = arith.constant 0 : i32
    return %c0_i32, %c0_i32_0 : i32, i32
  }
  func.func @transform_2(%arg0: i32) -> (i32, i32) {
    %c0_i32 = arith.constant 0 : i32
    %c0_i32_0 = arith.constant 0 : i32
    %c0_i32_1 = arith.constant 0 : i32
    return %c0_i32, %c0_i32_0 : i32, i32
  }
  func.func @transform_3(%arg0: i32) -> (i32, i32) {
    %c0_i32 = arith.constant 0 : i32
    %c0_i32_0 = arith.constant 0 : i32
    %c0_i32_1 = arith.constant 0 : i32
    return %c0_i32, %c0_i32_0 : i32, i32
  }
  func.func @transform_4(%arg0: i32) -> (i32, i32) {
    %c0_i32 = arith.constant 0 : i32
    %c0_i32_0 = arith.constant 0 : i32
    %c0_i32_1 = arith.constant 0 : i32
    return %c0_i32, %c0_i32_0 : i32, i32
  }
  func.func @transform_5(%arg0: i32) -> (i32, i32) {
    %c0_i32 = arith.constant 0 : i32
    %c0_i32_0 = arith.constant 0 : i32
    %c0_i32_1 = arith.constant 0 : i32
    return %c0_i32, %c0_i32_0 : i32, i32
  }
  func.func @transform_6(%arg0: i32) -> (i32, i32) {
    %c0_i32 = arith.constant 0 : i32
    %c0_i32_0 = arith.constant 0 : i32
    %c0_i32_1 = arith.constant 0 : i32
    return %c0_i32, %c0_i32_0 : i32, i32
  }
  func.func @transform_7(%arg0: i32) -> (i32, i32) {
    %c0_i32 = arith.constant 0 : i32
    %c0_i32_0 = arith.constant 0 : i32
    %c0_i32_1 = arith.constant 0 : i32
    return %c0_i32, %c0_i32_0 : i32, i32
  }
  func.func @transform_8(%arg0: i32) -> (i32, i32) {
    %c0_i32 = arith.constant 0 : i32
    %c0_i32_0 = arith.constant 0 : i32
    %c0_i32_1 = arith.constant 0 : i32
    return %c0_i32, %c0_i32_0 : i32, i32
  }
  func.func @transform_9(%arg0: i32) -> (i32, i32) {
    %c0_i32 = arith.constant 0 : i32
    %c0_i32_0 = arith.constant 0 : i32
    return %arg0, %c0_i32 : i32, i32
  }
}

</mosaic_0001>

<bundles_post_ra>
// kernel: tpu_custom_call.1
= control target key start
LH: loop header
LB: loop body
LE: loop exit
PB: predicated region body
PF: predicated region fallthrough
CT: control target
= control target key end

     0   :  { %14 = vsyncpa [#allocation3], 0  ;;  %s1026_s0 = inlined_call_operand.hbm [shape: f32[8,32], index: 0, kind: input, shape index: {}]   ;;  %s1027_s1 = inlined_call_operand.hbm [shape: bf16[32,256], index: 1, kind: input, shape index: {}]   ;;  %s1028_s2 = inlined_call_operand.vmem [shape: f32[1,256], index: 2, kind: input, shape index: {}]   ;;  %s1029_s3 = inlined_call_operand.hbm [shape: bf16[256,128], index: 3, kind: input, shape index: {}]   ;;  %s1030_s4 = inlined_call_operand.vmem [shape: f32[1,128], index: 4, kind: input, shape index: {}]   ;;  %s1031_s5 = inlined_call_operand.hbm [shape: bf16[128,128], index: 5, kind: input, shape index: {}]   ;;  %s1032_s6 = inlined_call_operand.vmem [shape: f32[1,128], index: 6, kind: input, shape index: {}]   ;;  %s1033_s7 = inlined_call_operand.hbm [shape: bf16[128,128], index: 7, kind: input, shape index: {}]   ;;  %s1034_s8 = inlined_call_operand.vmem [shape: f32[1,128], index: 8, kind: input, shape index: {}]   ;;  %s1035_s9 = inlined_call_operand.hbm [shape: bf16[8,128], index: 9, kind: output, shape index: {}]  }
   0x1   :  { %15 = vsyncpa [#allocation6], 0 }
   0x2   :  { %16 = vsyncpa [#allocation9], 0 }
   0x3   :  { %17 = vsyncpa [#allocation4], 0  ;;  %s906_s30 = smov [#allocation5]  }
   0x4   :  { %s33_s10 = sshll.u32 %s906_s30, 4  ;;  %s34_s10 = int_to_ptr.vmem [resolvable:$true] %s33_s10 }
   0x5   :  { %s786_s11 = scalar_lea.vmem %s34_s10, 512  ;;  %p791_p1 = scmp.lt.s32.totalorder %s34_s10, %s34_s10 }
   0x6   :  { %p787_p0 = scmp.ne.s32.totalorder %s34_s10, %s786_s11  ;;  %p792_p2 = scmp.lt.s32.totalorder %s786_s11, %s786_s11 }
   0x8   :  { %p793_p3 = por %p792_p2, %p791_p1 }
   0xa   :  { %p794_p4 = pnand %p793_p3, %p787_p0 }
   0xc   :  { %797 = shalt.err (!%p794_p4)
}
   0xd   :  { %s907_s12 = smov 128   ;;  %s908_s13 = smov 8  }
   0xe   :  { %39 = dma.hbm_to_vmem [thread:$0]  %s1027_s1, 512, %s34_s10, [#allocation6], %s907_s12, %s907_s12, %s908_s13  }
   0xf   :  { %s909_s16 = smov [#allocation8]   ;;  %s910_s18 = smov [#allocation2]  }
  0x10   :  { %s61_s17 = sshll.u32 %s909_s16, 4  ;;  %s24_s19 = sshll.u32 %s910_s18, 4  ;;  %s62_s17 = int_to_ptr.vmem [resolvable:$true] %s61_s17  ;;  %s25_s19 = int_to_ptr.vmem [resolvable:$true] %s24_s19 }
  0x11   :  { %s806_s20 = scalar_lea.vmem %s62_s17, 1024  ;;  %p811_p6 = scmp.lt.s32.totalorder %s62_s17, %s62_s17 }
  0x12   :  { %p807_p5 = scmp.ne.s32.totalorder %s62_s17, %s806_s20  ;;  %p812_p7 = scmp.lt.s32.totalorder %s806_s20, %s806_s20 }
  0x14   :  { %p813_p8 = por %p812_p7, %p811_p6 }
  0x16   :  { %p814_p9 = pnand %p813_p8, %p807_p5 }
  0x18   :  { %817 = shalt.err (!%p814_p9)
}
  0x19   :  { %s911_s21 = smov 64   ;;  %s912_s22 = smov 4  }
  0x1a   :  { %67 = dma.hbm_to_vmem [thread:$0]  %s1031_s5, 1024, %s62_s17, [#allocation9], %s911_s21, %s911_s21, %s912_s22  }
  0x1b   :  { %s826_s1 = scalar_lea.vmem %s25_s19, 128  ;;  %p831_p11 = scmp.lt.s32.totalorder %s25_s19, %s25_s19 }
  0x1c   :  { %p827_p10 = scmp.ne.s32.totalorder %s25_s19, %s826_s1  ;;  %p832_p12 = scmp.lt.s32.totalorder %s826_s1, %s826_s1 }
  0x1e   :  { %p833_p13 = por %p832_p12, %p831_p11 }
  0x20   :  { %p834_p0 = pnand %p833_p13, %p827_p10 }
  0x22   :  { %837 = shalt.err (!%p834_p0)
}
  0x23   :  { %27 = dma.hbm_to_vmem [thread:$0]  %s1026_s0, 128, %s25_s19, [#allocation3]  }
  0x24   :  { %s913_s27 = smov [#allocation7]   ;;  %s914_s29 = smov [#allocation10]  }
  0x25   :  { %s47_s28 = sshll.u32 %s913_s27, 4  ;;  %s75_s30 = sshll.u32 %s914_s29, 4  ;;  %s48_s28 = int_to_ptr.vmem [resolvable:$true] %s47_s28  ;;  %s76_s30 = int_to_ptr.vmem [resolvable:$true] %s75_s30 }
  0x26   :  { %s846_s10 = scalar_lea.vmem %s48_s28, 2048  ;;  %p851_p2 = scmp.lt.s32.totalorder %s48_s28, %s48_s28 }
  0x27   :  { %p847_p1 = scmp.ne.s32.totalorder %s48_s28, %s846_s10  ;;  %p852_p3 = scmp.lt.s32.totalorder %s846_s10, %s846_s10 }
  0x29   :  { %p853_p4 = por %p852_p3, %p851_p2 }
  0x2b   :  { %p854_p5 = pnand %p853_p4, %p847_p1 }
  0x2d   :  { %857 = shalt.err (!%p854_p5)
}
  0x2e   :  { %53 = dma.hbm_to_vmem [thread:$0]  %s1029_s3, 2048, %s48_s28, [#allocation6], %s911_s21, %s911_s21, %s912_s22  }
  0x2f   :  { %s866_s0 = scalar_lea.vmem %s76_s30, 1024  ;;  %p871_p7 = scmp.lt.s32.totalorder %s76_s30, %s76_s30 }
  0x30   :  { %p867_p6 = scmp.ne.s32.totalorder %s76_s30, %s866_s0  ;;  %p872_p8 = scmp.lt.s32.totalorder %s866_s0, %s866_s0 }
  0x32   :  { %p873_p9 = por %p872_p8, %p871_p7 }
  0x34   :  { %p874_p10 = pnand %p873_p9, %p867_p6 }
  0x36   :  { %877 = shalt.err (!%p874_p10)
}
  0x37   :  { %81 = dma.hbm_to_vmem [thread:$0]  %s1033_s7, 1024, %s76_s30, [#allocation9], %s911_s21, %s911_s21, %s912_s22  }
  0x38   :  { %898 = dma.done.wait [#allocation3], 128  }
  0x39   :  { %899 = vsyncadd [#allocation3], 4294967168 }
  0x3a   :  { %900 = dma.done.wait [#allocation6], 2560  }
  0x3b   :  { %901 = vsyncadd [#allocation6], 4294964736 }
  0x3c   :  { %902 = dma.done.wait [#allocation9], 2048  }
  0x3d   :  { %903 = vsyncadd [#allocation9], 4294965248  ;;  %v915_v0 = vmov 0   ;;  %v740_v1 = vld [vmem:[#allocation5 + $0x14] ss:$8 sps:$4 sm:$0xff]   ;;  %vm138_vm0 = vcmask 261120   ;;  %v108_v29 = vlaneseq }
  0x3e   :  { %174 = vmatprep.mubr.bf16.mxu0 %v915_v0  ;;  %v742_v2 = vld [vmem:[#allocation5 + $0x10] ss:$8 sps:$4 sm:$0xff]   ;;  %154 = vmatprep.subr.bf16.mxu0 %v740_v1  ;;  %v743_v3 = vld [vmem:[#allocation5 + $0x4] ss:$8 sps:$4 sm:$0xff]   ;;  %v745_v4 = vld [vmem:[#allocation5] ss:$8 sps:$4 sm:$0xff]  }
  0x3f   :  { %v100_v5 = vld [vmem:[#allocation2] sm:$0xff]  ;;  %155 = vmatpush1.bf16.msra.mxu0 %v742_v2  ;;  %v748_v8 = vld [vmem:[#allocation7 + $0x70] sm:$0xff]   ;;  %v750_v11 = vld [vmem:[#allocation7 + $0x68] sm:$0xff]   ;;  %v916_v24 = vmov 0.0   ;;  %v109_v30 = vshrl.u32 %v108_v29, 7  ;;  %vm917_vm1 = vmmov 0  }
  0x40   :  { %v746_v6 = vld [vmem:[#allocation7 + $0x78] sm:$0xff]   ;;  %156 = vmatprep.subr.bf16.mxu0 %v743_v3  ;;  %v101_v9 = vpack.c.bf16 %v100_v5, %v100_v5  ;;  %v749_v10 = vld [vmem:[#allocation7 + $0x30] sm:$0xff]   ;;  %v751_v12 = vld [vmem:[#allocation7 + $0x28] sm:$0xff]   ;;  %s918_s18 = smov [#allocation11]  }
  0x41   :  { %v747_v7 = vld [vmem:[#allocation7 + $0x38] sm:$0xff]   ;;  %647 = vmatprep.subr.bf16.mxu1 %v746_v6  ;;  %v752_v13 = vld [vmem:[#allocation7 + $0x60] sm:$0xff]   ;;  %v756_v17 = vld [vmem:[#allocation7 + $0x50] sm:$0xff]   ;;  %v110_v31 = vsub.s32 0, %v109_v30  ;;  %v114_v33 = vsub.s32 1, %v109_v30  ;;  %s596_s19 = sshll.u32 %s918_s18, 4  ;;  %s597_s19 = int_to_ptr.vmem [resolvable:$true] %s596_s19 }
  0x42   :  { %648 = vmatpush3.bf16.msra.mxu1 %v747_v7  ;;  %v753_v14 = vld [vmem:[#allocation7 + $0x20] sm:$0xff]   ;;  %v754_v15 = vld [vmem:[#allocation7 + $0x58] sm:$0xff]   ;;  %v757_v18 = vld [vmem:[#allocation7 + $0x10] sm:$0xff]   ;;  %p883_p12 = scmp.lt.s32.totalorder %s597_s19, %s597_s19 }
  0x43   :  { %157 = vmatpush1.bf16.msra.mxu0 %v745_v4  ;;  %649 = vmatprep.subr.bf16.mxu1 %v748_v8  ;;  %v755_v16 = vld [vmem:[#allocation7 + $0x18] sm:$0xff]   ;;  %v758_v19 = vld [vmem:[#allocation7 + $0x48] sm:$0xff]   ;;  %v760_v21 = vld [vmem:[#allocation7 + $0x40] sm:$0xff]  }
  0x44   :  { %v759_v20 = vld [vmem:[#allocation7 + $0x8] sm:$0xff]   ;;  %v761_v22 = vld [vmem:[#allocation7] sm:$0xff]   ;;  %v762_v23 = vld [vmem:[#allocation8 + $0x38] sm:$0xff]   ;;  %687 = vmatprep.subr.bf16.mxu0 %v916_v24 }
  0x45   :  { %v763_v25 = vld [vmem:[#allocation8 + $0x30] sm:$0xff]   ;;  %v764_v26 = vld [vmem:[#allocation8 + $0x28] sm:$0xff]   ;;  %v765_v27 = vld [vmem:[#allocation8 + $0x20] sm:$0xff]  }
  0x46   :  { %611 = vmatmul.mubr.msk.bf16.vlgmr.msra.gmra.mxu0 %vm138_vm0, %v101_v9  ;;  %650 = vmatpush3.bf16.msra.mxu1 %v749_v10  ;;  %v766_v28 = vld [vmem:[#allocation8 + $0x18] sm:$0xff]   ;;  %v767_v46 = vld [vmem:[#allocation8 + $0x10] sm:$0xff]   ;;  %v768_v47 = vld [vmem:[#allocation8 + $0x8] sm:$0xff]  }
  0x47   :  { %651 = vmatprep.subr.bf16.mxu1 %v750_v11  ;;  %688 = vmatpush3.bf16.msra.mxu0 %v762_v23  ;;  %v106_v32 = vld [vmem:[%s1028_s2] sm:$0x3]  ;;  %v769_v48 = vld [vmem:[#allocation8] sm:$0xff]   ;;  %v771_v50 = vld [vmem:[#allocation10 + $0x30] sm:$0xff]  }
  0x48   :  { %689 = vmatprep.subr.bf16.mxu0 %v916_v24  ;;  %v111_v34 = vrot.slane %v106_v32, %v110_v31  ;;  %v115_v35 = vrot.slane %v106_v32, %v114_v33  ;;  %703 = vmatprep.mubr.msk.bf16.mxu0 %vm917_vm1, %v916_v24  ;;  %v770_v49 = vld [vmem:[#allocation10 + $0x38] sm:$0xff]   ;;  %v772_v51 = vld [vmem:[#allocation10 + $0x28] sm:$0xff]   ;;  %v773_v52 = vld [vmem:[#allocation10 + $0x20] sm:$0xff]  }
  0x49   :  { %v774_v53 = vld [vmem:[#allocation10 + $0x18] sm:$0xff]   ;;  %v775_v54 = vld [vmem:[#allocation10 + $0x10] sm:$0xff]   ;;  %v776_v0 = vld [vmem:[#allocation10 + $0x8] sm:$0xff]  }
  0x4a   :  { %652 = vmatpush3.bf16.msra.mxu1 %v751_v12  ;;  %v612_v56 = vld [vmem:[%s1030_s4] ss:$0 sm:$0xff]  ;;  %v777_v1 = vld [vmem:[#allocation10] sm:$0xff]  }
  0x4b   :  { %653 = vmatprep.subr.bf16.mxu1 %v752_v13  ;;  %690 = vmatpush3.bf16.msra.mxu0 %v763_v25  ;;  %v629_v2 = vld [vmem:[%s1032_s6] ss:$0 sm:$0xff]  ;;  %s878_s6 = scalar_lea.vmem %s597_s19, 64 }
  0x4c   :  { %691 = vmatprep.subr.bf16.mxu0 %v916_v24  ;;  %v638_v10 = vld [vmem:[%s1034_s8] ss:$0 sm:$0xff]  ;;  %p879_p11 = scmp.ne.s32.totalorder %s597_s19, %s878_s6  ;;  %p884_p13 = scmp.lt.s32.totalorder %s878_s6, %s878_s6 }
  0x4e   :  { %654 = vmatpush3.bf16.msra.mxu1 %v753_v14  ;;  %p885_p0 = por %p884_p13, %p883_p12 }
  0x4f   :  { %655 = vmatprep.subr.bf16.mxu1 %v754_v15  ;;  %692 = vmatpush3.bf16.msra.mxu0 %v764_v26 }
  0x50   :  { %693 = vmatprep.subr.bf16.mxu0 %v916_v24  ;;  %p886_p1 = pnand %p885_p0, %p879_p11 }
  0x52   :  { %656 = vmatpush3.bf16.msra.mxu1 %v755_v16 }
  0x53   :  { %657 = vmatprep.subr.bf16.mxu1 %v756_v17  ;;  %694 = vmatpush3.bf16.msra.mxu0 %v765_v27 }
  0x54   :  { %695 = vmatprep.subr.bf16.mxu0 %v916_v24 }
  0x56   :  { %658 = vmatpush3.bf16.msra.mxu1 %v757_v18 }
  0x57   :  { %659 = vmatprep.subr.bf16.mxu1 %v758_v19  ;;  %696 = vmatpush3.bf16.msra.mxu0 %v766_v28 }
  0x58   :  { %697 = vmatprep.subr.bf16.mxu0 %v916_v24 }
  0x5a   :  { %660 = vmatpush3.bf16.msra.mxu1 %v759_v20 }
  0x5b   :  { %661 = vmatprep.subr.bf16.mxu1 %v760_v21  ;;  %698 = vmatpush3.bf16.msra.mxu0 %v767_v46 }
  0x5c   :  { %699 = vmatprep.subr.bf16.mxu0 %v916_v24 }
  0x5e   :  { %662 = vmatpush3.bf16.msra.mxu1 %v761_v22 }
  0x5f   :  { %707 = vmatprep.subr.bf16.mxu1 %v916_v24  ;;  %700 = vmatpush3.bf16.msra.mxu0 %v768_v47 }
  0x60   :  { %701 = vmatprep.subr.bf16.mxu0 %v916_v24 }
  0x63   :  { %702 = vmatpush3.bf16.msra.mxu0 %v769_v48 }
 0x106   :  { %v176_v36 = vpop.f32.mrf.mxu0 }
 0x107   :  { %v177_v37 = vadd.f32 %v176_v36, %v111_v34 }
 0x108   :  { %v178_v38 = vpop.f32.mrf.mxu0 }
 0x109   :  { %v179_v39 = vadd.f32 %v178_v38, %v115_v35  ;;  %v183_v40 = vmax.f32 %v177_v37, 0.0 }
 0x10a   :  { %v180_v41 = vpop.f32.mrf.mxu0 }
 0x10b   :  { %v184_v42 = vmax.f32 %v179_v39, 0.0  ;;  %v185_v45 = vpack.c.bf16 %v183_v40, %v183_v40 }
 0x10c   :  { %v181_v43 = vpop.f32.mrf.mxu0 }
 0x10d   :  { %v186_v44 = vpack.c.bf16 %v184_v42, %v184_v42 }
 0x10f   :  { %354 = vmatprep.mubr.bf16.mxu1 %v186_v44 }
 0x110   :  { %355 = vmatmul.mubr.bf16.vlgmr.msra.gmra.mxu1 %v185_v45 }
 0x111   :  { %723 = vmatprep.mubr.msk.bf16.mxu1 %vm917_vm1, %v916_v24  ;;  %708 = vmatpush3.bf16.msra.mxu1 %v770_v49 }
 0x112   :  { %709 = vmatprep.subr.bf16.mxu1 %v916_v24 }
 0x115   :  { %710 = vmatpush3.bf16.msra.mxu1 %v771_v50 }
 0x116   :  { %711 = vmatprep.subr.bf16.mxu1 %v916_v24 }
 0x119   :  { %712 = vmatpush3.bf16.msra.mxu1 %v772_v51 }
 0x11a   :  { %713 = vmatprep.subr.bf16.mxu1 %v916_v24 }
 0x11d   :  { %714 = vmatpush3.bf16.msra.mxu1 %v773_v52 }
 0x11e   :  { %715 = vmatprep.subr.bf16.mxu1 %v916_v24 }
 0x121   :  { %716 = vmatpush3.bf16.msra.mxu1 %v774_v53 }
 0x122   :  { %717 = vmatprep.subr.bf16.mxu1 %v916_v24 }
 0x125   :  { %718 = vmatpush3.bf16.msra.mxu1 %v775_v54 }
 0x126   :  { %719 = vmatprep.subr.bf16.mxu1 %v916_v24 }
 0x129   :  { %720 = vmatpush3.bf16.msra.mxu1 %v776_v0 }
 0x12a   :  { %721 = vmatprep.subr.bf16.mxu1 %v916_v24 }
 0x12d   :  { %722 = vmatpush3.bf16.msra.mxu1 %v777_v1 }
 0x1d0   :  { %v663_v55 = vpop.f32.mrf.mxu1 }
 0x1d2   :  { %v664_v57 = vpop.f32.mrf.mxu1 }
 0x1d3   :  { %v665_v58 = vadd.f32 %v664_v57, %v663_v55 }
 0x1d4   :  { %v666_v59 = vpop.f32.mrf.mxu1 }
 0x1d5   :  { %v357_v60 = vadd.f32 %v665_v58, %v612_v56 }
 0x1d6   :  { %v667_v61 = vpop.f32.mrf.mxu1 }
 0x1d7   :  { %v362_v62 = vmax.f32 %v357_v60, 0.0 }
 0x1d9   :  { %v363_v63 = vpack.c.bf16 %v362_v62, %v362_v62 }
 0x1db   :  { %704 = vmatmul.mubr.bf16.vlgmr.msra.gmra.mxu0 %v363_v63 }
 0x29b   :  { %v469_v3 = vpop.f32.mrf.mxu0 }
 0x29c   :  { %v470_v4 = vadd.f32 %v629_v2, %v469_v3 }
 0x29d   :  { %v705_v5 = vpop.f32.mrf.mxu0 }
 0x29e   :  { %v475_v6 = vmax.f32 %v470_v4, 0.0 }
 0x29f   :  { %v472_v7 = vpop.f32.mrf.mxu0 }
 0x2a0   :  { %v476_v8 = vpack.c.bf16 %v475_v6, %v475_v6 }
 0x2a1   :  { %v706_v9 = vpop.f32.mrf.mxu0 }
 0x2a2   :  { %724 = vmatmul.mubr.bf16.vlgmr.msra.gmra.mxu1 %v476_v8 }
 0x362   :  { %v582_v11 = vpop.f32.mrf.mxu1 }
 0x363   :  { %v583_v12 = vadd.f32 %v638_v10, %v582_v11 }
 0x364   :  { %v725_v13 = vpop.f32.mrf.mxu1 }
 0x365   :  { %v588_v14 = vpack.c.bf16 %v583_v12, %v583_v12 }
 0x366   :  { %v585_v15 = vpop.f32.mrf.mxu1 }
 0x367   :  { %589 = vst [vmem:[#allocation11] sm:$0xf] %v588_v14 }
 0x368   :  { %v726_v16 = vpop.f32.mrf.mxu1 }
 0x369   :  { %889 = shalt.err (!%p886_p1)
}
 0x36a   :  { %599 = dma.vmem_to_hbm [thread:$0]  %s597_s19, 64, %s1035_s9, [#allocation4]  }
 0x36b   :  { %904 = dma.done.wait [#allocation4], 64  }
 0x36c   :  { %905 = vsyncadd [#allocation4], 4294967232 }
 0x36d   :  { %603 = vsyncpa [#allocation3], 1 }
 0x36e   :  { %604 = vsyncpa [#allocation6], 1 }
 0x36f   :  { %605 = vsyncpa [#allocation9], 1 }
 0x370   :  { %606 = vsyncpa [#allocation4], 1 }

</bundles_post_ra>
